<compile_context>
chip_gen: v7x
topology: tpu7x:2x2x1
jax: 0.10.0
libtpu: 0.0.40
codegen_flags: <defaults>
</compile_context>

<pallas_src>
import jax
import jax.numpy as jnp
from jax.experimental import pallas as pl
from jax.experimental.pallas import tpu as pltpu


def simplenet_kernel(x_ref, w_ref, b_ref, out_ref):
    # One fused MXU matmul: (tm, 2*dim) @ (2*dim, 2*dim), f32 accumulation,
    # bias broadcast-add, then a single lane-dense store of the full output tile.
    acc = jnp.dot(x_ref[...], w_ref[...], preferred_element_type=jnp.float32)
    acc = acc + b_ref[...].astype(jnp.float32)
    out_ref[...] = acc.astype(out_ref.dtype)


def simplenet_forward(x, wx_t, wy_t, bx, by, *, block_batch=512, compute_dtype=None):
    """x: (B, 2*dim); wx_t/wy_t: (2*dim, dim); bx/by: (1, dim) -> (B, 2*dim).

    compute_dtype: optionally cast x / weights (e.g. jnp.bfloat16 on v6e/v7x).
    Accumulation is always f32; output dtype matches the input x dtype.
    """
    B, in_features = x.shape
    dim = wx_t.shape[1]
    out_features = 2 * dim  # == in_features
    out_dtype = x.dtype

    # Wrapper-side fusion of the two linears into one weight / one bias.
    w_fused = jnp.concatenate([wx_t, wy_t], axis=1)                       # (2*dim, 2*dim)
    b_fused = jnp.concatenate([bx.reshape(1, dim), by.reshape(1, dim)], 1)  # (1, 2*dim)

    if compute_dtype is not None:
        x = x.astype(compute_dtype)
        w_fused = w_fused.astype(compute_dtype)

    # Batch tile: as large as reasonable (amortizes ~0.35 us/step overhead),
    # but never larger than B. When tiling, keep tm a multiple of 8 (f32) /
    # 16 (bf16) for clean sublane packing; 512 satisfies both.
    tm = B if B <= block_batch else block_batch
    grid = (pl.cdiv(B, tm),)

    # Rough VMEM footprint (tiled x/out double-buffered, weights resident).
    x_bytes = jnp.dtype(x.dtype).itemsize
    w_bytes = jnp.dtype(w_fused.dtype).itemsize
    o_bytes = jnp.dtype(out_dtype).itemsize
    est = (2 * tm * in_features * x_bytes            # x tiles (double-buffered)
           + 2 * tm * out_features * o_bytes          # out tiles (double-buffered)
           + 2 * in_features * out_features * w_bytes  # fused weight
           + 2 * 8 * out_features * 4)                 # bias (padded to (8,128) tile)
    vmem_limit = int(est * 1.25) if est > (32 << 20) else None

    return pl.pallas_call(
        simplenet_kernel,
        out_shape=jax.ShapeDtypeStruct((B, out_features), out_dtype),
        grid=grid,
        in_specs=[
            pl.BlockSpec((tm, in_features), lambda i: (i, 0)),            # x: tiled over batch
            pl.BlockSpec((in_features, out_features), lambda i: (0, 0)),  # fused weight: resident
            pl.BlockSpec((1, out_features), lambda i: (0, 0)),            # fused bias: resident
        ],
        out_specs=pl.BlockSpec((tm, out_features), lambda i: (i, 0)),
        compiler_params=pltpu.CompilerParams(
            dimension_semantics=("parallel",),   # batch tiles are independent -> v7x dual-TC
            vmem_limit_bytes=vmem_limit,
        ),
    )(x, w_fused, b_fused)


def init_params(key, dim, dtype=jnp.float32):
    """Deterministic init mimicking nn.Linear(2*dim, dim): U(-1/sqrt(in), 1/sqrt(in))."""
    in_features = 2 * dim
    bound = 1.0 / jnp.sqrt(jnp.array(in_features, dtype=jnp.float32))
    k_wx, k_bx, k_wy, k_by = jax.random.split(key, 4)
    # PyTorch stores weight as (out, in); we keep the transposed (in, out) form.
    wx_t = jax.random.uniform(k_wx, (in_features, dim), dtype, -bound, bound)
    bx = jax.random.uniform(k_bx, (1, dim), dtype, -bound, bound)
    wy_t = jax.random.uniform(k_wy, (in_features, dim), dtype, -bound, bound)
    by = jax.random.uniform(k_by, (1, dim), dtype, -bound, bound)
    return wx_t, wy_t, bx, by


if __name__ == "__main__":
    # Toy shapes (matching the module spec). At this size the kernel is pure
    # launch/DMA overhead; tune tiling only at realistic B (>=256) / dim (>=128).
    dim = 32
    batch = 2

    key = jax.random.PRNGKey(0)
    k_x, k_params = jax.random.split(key)

    x = jax.random.normal(k_x, (batch, 2 * dim), jnp.float32)
    wx_t, wy_t, bx, by = init_params(k_params, dim)

    out = simplenet_forward(x, wx_t, wy_t, bx, by)
    out = jax.block_until_ready(out)

    # Reference in plain JAX (same semantics as the PyTorch module).
    ref = jnp.concatenate([x @ wx_t + bx, x @ wy_t + by], axis=1)
    assert out.shape == (batch, 2 * dim)
    assert jnp.allclose(out, ref, atol=1e-5, rtol=1e-5)

    print("KERNEL_OK")
</pallas_src>

<mosaic_0001>
module attributes {stable_mosaic.version = 11 : i64} {
  func.func @simplenet_kernel(%arg0: i32, %arg1: memref<2x64xf32, #tpu.memory_space<vmem>>, %arg2: memref<64x64xf32, #tpu.memory_space<vmem>>, %arg3: memref<1x64xf32, #tpu.memory_space<vmem>>, %arg4: memref<2x64xf32, #tpu.memory_space<vmem>>) attributes {dimension_semantics = [#tpu.dimension_semantics<parallel>], iteration_bounds = array<i64: 1>, scalar_prefetch = 0 : i64, scratch_operands = 0 : i64, tpu.core_type = #tpu.core_type<tc>, window_params = [{transform_indices = @transform_0, window_bounds = array<i64: 2, 64>}, {pipeline_mode = #tpu.pipeline_mode<synchronous>, transform_indices = @transform_1, window_bounds = array<i64: 64, 64>}, {pipeline_mode = #tpu.pipeline_mode<synchronous>, transform_indices = @transform_2, window_bounds = array<i64: 1, 64>}, {transform_indices = @transform_3, window_bounds = array<i64: 2, 64>}]} {
    %c0 = arith.constant 0 : index
    %c0_0 = arith.constant 0 : index
    %0 = vector.load %arg1[%c0, %c0_0] : memref<2x64xf32, #tpu.memory_space<vmem>>, vector<2x64xf32>
    %c0_1 = arith.constant 0 : index
    %c0_2 = arith.constant 0 : index
    %1 = vector.load %arg2[%c0_1, %c0_2] : memref<64x64xf32, #tpu.memory_space<vmem>>, vector<64x64xf32>
    %cst = arith.constant dense<0.000000e+00> : vector<2x64xf32>
    %2 = tpu.matmul %0, %1, %cst {dimension_numbers = #tpu.dot_dimension_numbers<[1], [0], [0], [1], [0, 0, 1, 1], [], []>} : vector<2x64xf32>, vector<64x64xf32>, vector<2x64xf32> -> vector<2x64xf32>
    %c0_3 = arith.constant 0 : index
    %c0_4 = arith.constant 0 : index
    %3 = vector.load %arg3[%c0_3, %c0_4] : memref<1x64xf32, #tpu.memory_space<vmem>>, vector<1x64xf32>
    %4 = vector.broadcast %3 : vector<1x64xf32> to vector<2x64xf32>
    %5 = arith.addf %2, %4 : vector<2x64xf32>
    %c0_5 = arith.constant 0 : index
    %c0_6 = arith.constant 0 : index
    %6 = vector.load %arg4[%c0_5, %c0_6] : memref<2x64xf32, #tpu.memory_space<vmem>>, vector<2x64xf32>
    tpu.vector_store %arg4[%c0_5, %c0_6], %5 {strides = array<i32>} : memref<2x64xf32, #tpu.memory_space<vmem>>, vector<2x64xf32>,
    return
  }
  func.func @transform_0(%arg0: i32) -> (i32, i32) {
    %c0_i32 = arith.constant 0 : i32
    %c0_i32_0 = arith.constant 0 : i32
    return %arg0, %c0_i32 : i32, i32
  }
  func.func @transform_1(%arg0: i32) -> (i32, i32) {
    %c0_i32 = arith.constant 0 : i32
    %c0_i32_0 = arith.constant 0 : i32
    %c0_i32_1 = arith.constant 0 : i32
    return %c0_i32, %c0_i32_0 : i32, i32
  }
  func.func @transform_2(%arg0: i32) -> (i32, i32) {
    %c0_i32 = arith.constant 0 : i32
    %c0_i32_0 = arith.constant 0 : i32
    %c0_i32_1 = arith.constant 0 : i32
    return %c0_i32, %c0_i32_0 : i32, i32
  }
  func.func @transform_3(%arg0: i32) -> (i32, i32) {
    %c0_i32 = arith.constant 0 : i32
    %c0_i32_0 = arith.constant 0 : i32
    return %arg0, %c0_i32 : i32, i32
  }
}

</mosaic_0001>

<bundles_post_ra>
// kernel: tpu_custom_call.1
= control target key start
LH: loop header
LB: loop body
LE: loop exit
PB: predicated region body
PF: predicated region fallthrough
CT: control target
= control target key end

     0   :  { %8 = vsyncpa [#allocation3], 0  ;;  %s345_s0 = inlined_call_operand.hbm [shape: f32[2,64], index: 0, kind: input, shape index: {}]   ;;  %s346_s1 = inlined_call_operand.hbm [shape: f32[64,64], index: 1, kind: input, shape index: {}]   ;;  %s347_s2 = inlined_call_operand.vmem [shape: f32[1,64], index: 2, kind: input, shape index: {}]   ;;  %s348_s3 = inlined_call_operand.hbm [shape: f32[2,64], index: 3, kind: output, shape index: {}]  }
   0x1   :  { %9 = vsyncpa [#allocation6], 0 }
   0x2   :  { %10 = vsyncpa [#allocation4], 0  ;;  %s271_s12 = smov [#allocation2]   ;;  %s272_s14 = smov [#allocation5]  }
   0x3   :  { %s17_s13 = sshll.u32 %s271_s12, 4  ;;  %s26_s15 = sshll.u32 %s272_s14, 4  ;;  %s18_s13 = int_to_ptr.vmem [resolvable:$true] %s17_s13  ;;  %s299_s15 = int_to_ptr.vmem [resolvable:$true] %s26_s15 }
   0x4   :  { %s199_s18 = scalar_lea.hbm %s345_s0, 32 }
   0x5   :  { %p200_p0 = scmp.ne.s32.totalorder %s345_s0, %s199_s18  ;;  %p203_p1 = scmp.lt.u32.totalorder %s199_s18, %s345_s0 }
   0x7   :  { %p205_p2 = pnand %p203_p1, %p200_p0 }
   0x9   :  { %208 = shalt.err (!%p205_p2)
}
   0xa   :  { %s209_s23 = scalar_lea.vmem %s18_s13, 32  ;;  %p214_p4 = scmp.lt.s32.totalorder %s18_s13, %s18_s13 }
   0xb   :  { %p210_p3 = scmp.ne.s32.totalorder %s18_s13, %s209_s23  ;;  %p215_p5 = scmp.lt.s32.totalorder %s209_s23, %s209_s23 }
   0xd   :  { %p216_p6 = por %p215_p5, %p214_p4 }
   0xf   :  { %p217_p7 = pnand %p216_p6, %p210_p3 }
  0x11   :  { %220 = shalt.err (!%p217_p7)
}
  0x12   :  { %20 = dma.hbm_to_vmem [thread:$0]  %s345_s0, 32, %s18_s13, [#allocation3]  }
  0x13   :  { %s221_s28 = scalar_lea.hbm %s346_s1, 1024 }
  0x14   :  { %p222_p8 = scmp.ne.s32.totalorder %s346_s1, %s221_s28  ;;  %p225_p9 = scmp.lt.u32.totalorder %s221_s28, %s346_s1 }
  0x16   :  { %p227_p10 = pnand %p225_p9, %p222_p8 }
  0x18   :  { %230 = shalt.err (!%p227_p10)
}
  0x19   :  { %s231_s6 = scalar_lea.vmem %s299_s15, 1024  ;;  %p236_p12 = scmp.lt.s32.totalorder %s299_s15, %s299_s15 }
  0x1a   :  { %p232_p11 = scmp.ne.s32.totalorder %s299_s15, %s231_s6  ;;  %p237_p13 = scmp.lt.s32.totalorder %s231_s6, %s231_s6 }
  0x1c   :  { %p238_p0 = por %p237_p13, %p236_p12 }
  0x1e   :  { %p239_p1 = pnand %p238_p0, %p232_p11 }
  0x20   :  { %242 = shalt.err (!%p239_p1)
}
  0x21   :  { %s273_s0 = smov 128   ;;  %s274_s7 = smov 8  }
  0x22   :  { %32 = dma.hbm_to_vmem [thread:$0]  %s346_s1, 1024, %s299_s15, [#allocation6], %s273_s0, %s273_s0, %s274_s7  }
  0x23   :  { %265 = dma.done.wait [#allocation3], 32  }
  0x24   :  { %266 = vsyncadd [#allocation3], 4294967264 }
  0x25   :  { %267 = dma.done.wait [#allocation6], 1024  }
  0x26   :  { %268 = vsyncadd [#allocation6], 4294966272  ;;  %v275_v0 = vmov 0.0|0.0   ;;  %vm276_vm0 = vmmov 0   ;;  %v277_v1 = vmov 0.0   ;;  %v42_v2 = vld [vmem:[#allocation5] sm:$0xff] }
  0x27   :  { %179 = vmatprep.subr.bf16.mxu0 %v275_v0  ;;  %176 = vmatprep.mubr.msk.f32.mxu0 %vm276_vm0, %v277_v1  ;;  %v43_v3 = vld [vmem:[#allocation5 + $0x8] sm:$0xff]  ;;  %v44_v4 = vld [vmem:[#allocation5 + $0x10] sm:$0xff]  ;;  %v45_v6 = vld [vmem:[#allocation5 + $0x18] sm:$0xff]  ;;  %vm57_vm1 = vcmask 523264   ;;  %s278_s11 = smov [#allocation7]   ;;  %vm131_vm2 = vcmask 517120  }
  0x28   :  { %v180_v5 = vpack.c.bf16 %v43_v3, %v42_v2  ;;  %v183_v7 = vpack.c.bf16 %v45_v6, %v44_v4  ;;  %v46_v8 = vld [vmem:[#allocation5 + $0x20] sm:$0xff]  ;;  %v47_v9 = vld [vmem:[#allocation5 + $0x28] sm:$0xff]  ;;  %v48_v11 = vld [vmem:[#allocation5 + $0x30] sm:$0xff]  ;;  %s139_s12 = sshll.u32 %s278_s11, 4  ;;  %s140_s12 = int_to_ptr.vmem [resolvable:$true] %s139_s12 }
  0x29   :  { %v186_v10 = vpack.c.bf16 %v47_v9, %v46_v8  ;;  %v49_v12 = vld [vmem:[#allocation5 + $0x38] sm:$0xff]  ;;  %s243_s13 = scalar_lea.vmem %s140_s12, 32  ;;  %p248_p3 = scmp.lt.s32.totalorder %s140_s12, %s140_s12 }
  0x2a   :  { %181 = vmatpush3.bf16.msra.mxu0 %v180_v5  ;;  %v189_v13 = vpack.c.bf16 %v49_v12, %v48_v11  ;;  %v41_v14 = vld [vmem:[#allocation2] sm:$0x3]  ;;  %p244_p2 = scmp.ne.s32.totalorder %s140_s12, %s243_s13  ;;  %p249_p4 = scmp.lt.s32.totalorder %s243_s13, %s243_s13 }
  0x2b   :  { %182 = vmatprep.subr.bf16.mxu0 %v275_v0  ;;  %v149_v15 = vld [vmem:[%s347_s2] ss:$0 sm:$0xff] }
  0x2c   :  { %p250_p5 = por %p249_p4, %p248_p3 }
  0x2e   :  { %184 = vmatpush3.bf16.msra.mxu0 %v183_v7  ;;  %p251_p6 = pnand %p250_p5, %p244_p2 }
  0x2f   :  { %185 = vmatprep.subr.bf16.mxu0 %v275_v0 }
  0x32   :  { %187 = vmatpush3.bf16.msra.mxu0 %v186_v10 }
  0x33   :  { %188 = vmatprep.subr.bf16.mxu0 %v275_v0 }
  0x36   :  { %190 = vmatpush3.bf16.msra.mxu0 %v189_v13 }
  0x39   :  { %177 = vmatmul.mubr.msk.f32.vlgmr.msra.gmra.mrb[0].mxu0 %vm57_vm1, %v41_v14 }
 0x10c   :  { %v127_v16 = vpop.f32.mrb[0].mxu0 }
 0x10d   :  { %v128_v17 = vadd.f32 %v149_v15, %v127_v16  ;;  %v178_v18 = vpop.f32.mrb[1].mxu0 }
 0x10f   :  { %132 = vst.msk [vmem:[#allocation7] sm:$0x3] %vm131_vm2, %v128_v17 }
 0x110   :  { %254 = shalt.err (!%p251_p6)
}
 0x111   :  { %s255_s16 = scalar_lea.hbm %s348_s3, 32 }
 0x112   :  { %p256_p7 = scmp.ne.s32.totalorder %s348_s3, %s255_s16  ;;  %p259_p8 = scmp.lt.u32.totalorder %s255_s16, %s348_s3 }
 0x114   :  { %p261_p9 = pnand %p259_p8, %p256_p7 }
 0x116   :  { %264 = shalt.err (!%p261_p9)
}
 0x117   :  { %142 = dma.vmem_to_hbm [thread:$0]  %s140_s12, 32, %s348_s3, [#allocation4]  }
 0x118   :  { %269 = dma.done.wait [#allocation4], 32  }
 0x119   :  { %270 = vsyncadd [#allocation4], 4294967264 }
 0x11a   :  { %146 = vsyncpa [#allocation3], 1 }
 0x11b   :  { %147 = vsyncpa [#allocation6], 1 }
 0x11c   :  { %148 = vsyncpa [#allocation4], 1 }

</bundles_post_ra>
